<compile_context>
chip_gen: v5e
topology: v5e:2x2
jax: 0.10.0
libtpu: 0.0.40
codegen_flags: <defaults>
</compile_context>

<pallas_src>
import math

import jax
import jax.numpy as jnp
from jax.experimental import pallas as pl
from jax.experimental.pallas import tpu as pltpu

EMBED = 384
MAX_LEN = 100


def make_positional_encoding_table(embed_size=EMBED, max_len=MAX_LEN, dtype=jnp.float32):
    """Mirror of the torch __init__: pe[p, 2i] = sin(p * w_i), pe[p, 2i+1] = cos(p * w_i)."""
    position = jnp.arange(max_len, dtype=jnp.float32)[:, None]                        # (L, 1)
    div_term = jnp.exp(jnp.arange(0, embed_size, 2, dtype=jnp.float32)
                       * (-math.log(10000.0) / embed_size))                           # (E/2,)
    ang = position * div_term                                                         # (L, E/2)
    pe = jnp.zeros((max_len, embed_size), jnp.float32)
    pe = pe.at[:, 0::2].set(jnp.sin(ang))
    pe = pe.at[:, 1::2].set(jnp.cos(ang))
    return pe.astype(dtype)                                                           # (L, E)


def _pos_enc_kernel(x_ref, pe_ref, o_ref):
    # Works for both paths:
    #   2D: x (row_tile, E) + pe (row_tile, E)
    #   3D: x (b_tile, S, E) + pe (S, E)  -> numpy broadcasting over the batch tile
    o_ref[...] = x_ref[...] + pe_ref[...]


def _tpu_generation():
    """Best-effort TPU-generation detection; falls back to conservative defaults."""
    try:
        kind = jax.devices()[0].device_kind.lower()
    except Exception:
        return "unknown"
    if "v7" in kind or "7x" in kind:
        return "v7x"
    if "v6" in kind:
        return "v6e"
    if "v5" in kind:
        return "v5e"
    return "unknown"


def _budget_for_generation(gen):
    """Returns (per-block byte budget, explicit vmem limit or None, multi_tensorcore)."""
    # Total resident VMEM ~= 2*x_block + 2*out_block + pe_block(s) ~ 5-6 blocks.
    if gen == "v7x":
        # ~3.2 TB/s HBM: 2 MiB blocks leave the 0.35 us/step overhead as a ~25% tax;
        # 6 MiB blocks cut it to <7%.  6 blocks * 6 MiB = 36 MiB > 32 MiB scoped default,
        # so raise the limit explicitly (still well under 64 MiB physical).
        return 6 * 1024 * 1024, 48 << 20, True
    if gen == "v6e":
        # 6 * 4 MiB = 24 MiB fits the 32 MiB scoped default.
        return 4 * 1024 * 1024, None, False
    # v5e / unknown: 6 * 2 MiB = 12 MiB fits v5e's 16 MiB scoped default; at ~0.8 TB/s
    # 2 MiB blocks already amortize the per-step overhead to ~5%.
    return 2 * 1024 * 1024, None, False


def positional_encoding(x, pe, *, block_budget_bytes=None, donate_x=False):
    """x: (N, S, E); pe: (max_len, E) sinusoidal table. Returns x + pe[:S] (broadcast over N)."""
    N, S, E = x.shape
    assert pe.shape[1] == E, "embed size mismatch"
    assert S <= pe.shape[0], "sequence longer than positional-encoding table (max_len)"

    # Forward only uses the first S rows.  Cast to the activation dtype; torch would
    # instead promote x to the fp32 pe buffer's dtype (negligible for pos-encodings).
    pe_s = pe[:S].astype(x.dtype)

    gen = _tpu_generation()
    budget, vmem_limit, multi_tc = _budget_for_generation(gen)
    if block_budget_bytes is not None:
        budget = block_budget_bytes

    itemsize = jnp.dtype(x.dtype).itemsize
    sublanes = max(8, 32 // itemsize)          # 8 (f32), 16 (bf16), 32 (int8)
    row_bytes = E * itemsize

    # ---- preferred path: flatten to (N*S, E) rows, tile rows --------------------------
    total_rows = N * S
    rows_budget = max(1, budget // row_bytes)
    k_max = max(1, min(N, rows_budget // S))   # batch elements per block
    if multi_tc and N >= 2:
        # Keep >= 2 grid steps so both v7x TensorCores get work on the "parallel" axis.
        k_max = min(k_max, pl.cdiv(N, 2))
    k_align = math.lcm(S, sublanes) // S       # smallest k with (k*S) % sublanes == 0

    compiler_params = pltpu.CompilerParams(
        dimension_semantics=("parallel",),
        vmem_limit_bytes=vmem_limit,
    )
    aliases = {0: 0} if donate_x else {}

    if k_max >= k_align:
        # Sublane-aligned row tile that is also a multiple of S (so pe stays aligned,
        # including on the ragged final block, whose start row is a multiple of row_tile
        # and hence of S).
        k = (k_max // k_align) * k_align
        row_tile = k * S
        grid = (pl.cdiv(total_rows, row_tile),)

        x_flat = x.reshape(total_rows, E)
        # Pre-tile pe to the row tile: the kernel add is then a plain dense 2D add and
        # pe is fetched to VMEM once (constant block index) and re-used every step.
        pe_block = jnp.tile(pe_s, (k, 1))                            # (row_tile, E)

        act_spec = pl.BlockSpec((row_tile, E), lambda i: (i, 0))
        pe_spec = pl.BlockSpec((row_tile, E), lambda i: (0, 0))

        out_flat = pl.pallas_call(
            _pos_enc_kernel,
            out_shape=jax.ShapeDtypeStruct((total_rows, E), x.dtype),
            grid=grid,
            in_specs=[act_spec, pe_spec],
            out_specs=act_spec,
            input_output_aliases=aliases,
            compiler_params=compiler_params,
        )(x_flat, pe_block)
        return out_flat.reshape(N, S, E)

    # ---- fallback path: (b_tile, S, E) blocks (always layout-legal) -------------------
    b_tile = k_max                             # >= 1
    grid = (pl.cdiv(N, b_tile),)
    act_spec = pl.BlockSpec((b_tile, S, E), lambda n: (n, 0, 0))
    pe_spec = pl.BlockSpec((S, E), lambda n: (0, 0))

    return pl.pallas_call(
        _pos_enc_kernel,
        out_shape=jax.ShapeDtypeStruct((N, S, E), x.dtype),
        grid=grid,
        in_specs=[act_spec, pe_spec],
        out_specs=act_spec,
        input_output_aliases=aliases,
        compiler_params=compiler_params,
    )(x, pe_s)


def reference_positional_encoding(x, pe):
    """Pure-JAX mirror of the torch forward: x + pe[None, :S, :]."""
    S = x.shape[1]
    return x + pe[None, :S, :]


if __name__ == "__main__":
    key = jax.random.PRNGKey(0)
    N, S = 2, 8
    x = jax.random.normal(key, (N, S, EMBED), jnp.float32)
    pe = make_positional_encoding_table(EMBED, MAX_LEN)

    out = positional_encoding(x, pe)
    out = jax.block_until_ready(out)

    ref = reference_positional_encoding(x, pe)
    assert out.shape == (N, S, EMBED)
    max_err = float(jnp.max(jnp.abs(out - ref)))
    assert jnp.allclose(out, ref, rtol=1e-6, atol=1e-6), f"max abs err = {max_err}"

    # TODO(synk): the torch module's print() debug logging has no kernel equivalent; omitted.
    print("KERNEL_OK")
</pallas_src>

<mosaic_0001>
module attributes {stable_mosaic.version = 11 : i64} {
  func.func @_pos_enc_kernel(%arg0: i32, %arg1: memref<16x384xf32, #tpu.memory_space<vmem>>, %arg2: memref<16x384xf32, #tpu.memory_space<vmem>>, %arg3: memref<16x384xf32, #tpu.memory_space<vmem>>) attributes {dimension_semantics = [#tpu.dimension_semantics<parallel>], iteration_bounds = array<i64: 1>, scalar_prefetch = 0 : i64, scratch_operands = 0 : i64, tpu.core_type = #tpu.core_type<tc>, window_params = [{transform_indices = @transform_0, window_bounds = array<i64: 16, 384>}, {pipeline_mode = #tpu.pipeline_mode<synchronous>, transform_indices = @transform_1, window_bounds = array<i64: 16, 384>}, {transform_indices = @transform_2, window_bounds = array<i64: 16, 384>}]} {
    %c0 = arith.constant 0 : index
    %c0_0 = arith.constant 0 : index
    %0 = vector.load %arg1[%c0, %c0_0] : memref<16x384xf32, #tpu.memory_space<vmem>>, vector<16x384xf32>
    %c0_1 = arith.constant 0 : index
    %c0_2 = arith.constant 0 : index
    %1 = vector.load %arg2[%c0_1, %c0_2] : memref<16x384xf32, #tpu.memory_space<vmem>>, vector<16x384xf32>
    %2 = arith.addf %0, %1 : vector<16x384xf32>
    %c0_3 = arith.constant 0 : index
    %c0_4 = arith.constant 0 : index
    %3 = vector.load %arg3[%c0_3, %c0_4] : memref<16x384xf32, #tpu.memory_space<vmem>>, vector<16x384xf32>
    tpu.vector_store %arg3[%c0_3, %c0_4], %2 {strides = array<i32>} : memref<16x384xf32, #tpu.memory_space<vmem>>, vector<16x384xf32>,
    return
  }
  func.func @transform_0(%arg0: i32) -> (i32, i32) {
    %c0_i32 = arith.constant 0 : i32
    %c0_i32_0 = arith.constant 0 : i32
    return %arg0, %c0_i32 : i32, i32
  }
  func.func @transform_1(%arg0: i32) -> (i32, i32) {
    %c0_i32 = arith.constant 0 : i32
    %c0_i32_0 = arith.constant 0 : i32
    %c0_i32_1 = arith.constant 0 : i32
    return %c0_i32, %c0_i32_0 : i32, i32
  }
  func.func @transform_2(%arg0: i32) -> (i32, i32) {
    %c0_i32 = arith.constant 0 : i32
    %c0_i32_0 = arith.constant 0 : i32
    return %arg0, %c0_i32 : i32, i32
  }
}

</mosaic_0001>

<bundles_post_ra>
// kernel: tpu_custom_call.1
= control target key start
LH: loop header
LB: loop body
LE: loop exit
PB: predicated region body
PF: predicated region fallthrough
CT: control target
= control target key end

     0   :  { %7 = vsyncpa [#allocation3], 0  ;;  %s209_s0 = inlined_call_operand.hbm [shape: f32[16,384], index: 0, kind: input, shape index: {}]   ;;  %s210_s1 = inlined_call_operand.hbm [shape: f32[16,384], index: 1, kind: input, shape index: {}]   ;;  %s211_s2 = inlined_call_operand.hbm [shape: f32[16,384], index: 2, kind: output, shape index: {}]  }
   0x1   :  { %8 = vsyncpa [#allocation6], 0 }
   0x2   :  { %9 = vsyncpa [#allocation4], 0  ;;  %s14_s11 = sshll.u32 %s209_s0, 4  ;;  %s171_s12 = smov [#allocation2]   ;;  %s15_s11 = int_to_ptr.hbm [resolvable:$true] %s14_s11 }
   0x3   :  { %s16_s13 = sshll.u32 %s171_s12, 4  ;;  %s27_s16 = sshll.u32 %s210_s1, 4  ;;  %s17_s13 = int_to_ptr.vmem [resolvable:$true] %s16_s13  ;;  %s28_s16 = int_to_ptr.hbm [resolvable:$true] %s27_s16 }
   0x4   :  { %s172_s17 = smov 384   ;;  %s173_s18 = smov 24  }
   0x5   :  { %22 = dma.hbm_to_vmem [thread:$0]  %s15_s11, 768, %s17_s13, [#allocation3], %s172_s17, %s172_s17, %s173_s18  }
   0x6   :  { %s174_s19 = smov [#allocation5]  }
   0x7   :  { %s29_s20 = sshll.u32 %s174_s19, 4  ;;  %s30_s20 = int_to_ptr.vmem [resolvable:$true] %s29_s20 }
   0x8   :  { %35 = dma.hbm_to_vmem [thread:$0]  %s28_s16, 768, %s30_s20, [#allocation6], %s172_s17, %s172_s17, %s173_s18  }
   0x9   :  { %165 = dma.done.wait [#allocation3], 768  }
   0xa   :  { %166 = vsyncadd [#allocation3], 4294966528 }
   0xb   :  { %167 = dma.done.wait [#allocation6], 768  }
   0xc   :  { %168 = vsyncadd [#allocation6], 4294966528  ;;  %v44_v0 = vld [vmem:[#allocation2] sm:$0xff]  ;;  %v50_v1 = vld [vmem:[#allocation5] sm:$0xff]  ;;  %s175_s0 = smov [#allocation7]   ;;  %s74_s23 = sshll.u32 %s211_s2, 4  ;;  %s75_s23 = int_to_ptr.hbm [resolvable:$true] %s74_s23 }
   0xd   :  { %v45_v2 = vld [vmem:[#allocation2 + $0x8] sm:$0xff]  ;;  %v56_v3 = vadd.f32 %v50_v1, %v44_v0  ;;  %v51_v4 = vld [vmem:[#allocation5 + $0x8] sm:$0xff]  ;;  %v46_v5 = vld [vmem:[#allocation2 + $0x10] sm:$0xff]  ;;  %s72_s1 = sshll.u32 %s175_s0, 4  ;;  %s73_s1 = int_to_ptr.vmem [resolvable:$true] %s72_s1 }
   0xe   :  { %v52_v6 = vld [vmem:[#allocation5 + $0x10] sm:$0xff]  ;;  %v57_v7 = vadd.f32 %v51_v4, %v45_v2  ;;  %v47_v9 = vld [vmem:[#allocation2 + $0x18] sm:$0xff]  ;;  %v53_v10 = vld [vmem:[#allocation5 + $0x18] sm:$0xff] }
   0xf   :  { %v58_v8 = vadd.f32 %v52_v6, %v46_v5  ;;  %v48_v11 = vld [vmem:[#allocation2 + $0x20] sm:$0xff]  ;;  %62 = vst [vmem:[#allocation7] sm:$0xff] %v56_v3  ;;  %v59_v12 = vadd.f32 %v53_v10, %v47_v9  ;;  %v54_v13 = vld [vmem:[#allocation5 + $0x20] sm:$0xff]  ;;  %v49_v14 = vld [vmem:[#allocation2 + $0x28] sm:$0xff] }
  0x10   :  { %v55_v15 = vld [vmem:[#allocation5 + $0x28] sm:$0xff]  ;;  %63 = vst [vmem:[#allocation7 + $0x8] sm:$0xff] %v57_v7  ;;  %v60_v16 = vadd.f32 %v54_v13, %v48_v11 }
  0x11   :  { %v61_v17 = vadd.f32 %v55_v15, %v49_v14  ;;  %64 = vst [vmem:[#allocation7 + $0x10] sm:$0xff] %v58_v8 }
  0x12   :  { %65 = vst [vmem:[#allocation7 + $0x18] sm:$0xff] %v59_v12 }
  0x13   :  { %66 = vst [vmem:[#allocation7 + $0x20] sm:$0xff] %v60_v16 }
  0x14   :  { %67 = vst [vmem:[#allocation7 + $0x28] sm:$0xff] %v61_v17 }
  0x15   :  { %80 = dma.vmem_to_hbm [thread:$0]  %s73_s1, 768, %s75_s23, [#allocation4], %s172_s17, %s172_s17, %s173_s18  }
  0x16   :  { %169 = dma.done.wait [#allocation4], 768  }
  0x17   :  { %170 = vsyncadd [#allocation4], 4294966528 }
  0x18   :  { %85 = vsyncpa [#allocation3], 1 }
  0x19   :  { %86 = vsyncpa [#allocation6], 1 }
  0x1a   :  { %87 = vsyncpa [#allocation4], 1 }

</bundles_post_ra>
